<compile_context>
chip_gen: v7x
topology: tpu7x:2x2x1
jax: 0.10.0
libtpu: 0.0.40
codegen_flags: <defaults>
</compile_context>

<pallas_src>
import jax
import jax.numpy as jnp
from jax.experimental import pallas as pl
from jax.experimental.pallas import tpu as pltpu

_TILE_BYTE_BUDGET = 4 * 1024 * 1024      # ~4 MiB of image data per tile
_MAX_BLOCK_L = 8192                      # lane-dim cap (multiple of 128)
_MIB = 1024 * 1024


def _normalize_kernel(scale_ref, bias_ref, img_ref, out_ref):
    # scale_ref / bias_ref: (block_r, 1) or (1, block_l) VMEM param tiles
    # img_ref / out_ref:    (block_r, block_l) VMEM tiles
    x = img_ref[...]
    s = scale_ref[...].astype(x.dtype)   # per-use cast (no full-tile upcast)
    b = bias_ref[...].astype(x.dtype)
    out_ref[...] = (x * s + b).astype(out_ref.dtype)


def _pick_blocks(R, L, itemsize):
    """Choose (block_r, block_l) obeying the (8, 128) tiling rule, byte-budgeted."""
    elem_budget = max(8 * 128, _TILE_BYTE_BUDGET // itemsize)
    block_l = L if L <= _MAX_BLOCK_L else _MAX_BLOCK_L      # full extent or mult of 128
    rows_budget = max(8, elem_budget // block_l)
    if R <= rows_budget:
        block_r = R                                          # full extent -> legal
    else:
        block_r = max(8, (rows_budget // 8) * 8)             # multiple of 8
    return block_r, block_l


def _ensure_multi_step(R, L, block_r, block_l):
    """Guarantee >= 2 grid steps (when legal) so both v7x TensorCores get work."""
    if pl.cdiv(R, block_r) * pl.cdiv(L, block_l) >= 2:
        return block_r, block_l
    if R >= 16:                                   # prefer splitting rows (keeps lanes wide)
        return max(8, (R // 2 // 8) * 8), block_l
    if L >= 256:
        return block_r, max(128, (L // 2 // 128) * 128)
    return block_r, block_l                       # tiny problem: single step is fine


def _normalize_2d(img2d, scale2d, bias2d, out_dtype):
    R, L = img2d.shape
    itemsize = jnp.dtype(img2d.dtype).itemsize
    block_r, block_l = _pick_blocks(R, L, itemsize)
    block_r, block_l = _ensure_multi_step(R, L, block_r, block_l)
    grid = (pl.cdiv(R, block_r), pl.cdiv(L, block_l))

    if scale2d.shape[1] == 1:                     # per-row params (R, 1)
        p_block = (block_r, 1)
        p_map = lambda i, j: (i, 0)
    else:                                         # per-lane params (1, L)
        p_block = (1, block_l)
        p_map = lambda i, j: (0, j)

    out_itemsize = jnp.dtype(out_dtype).itemsize
    tile_bytes = block_r * block_l * (itemsize + out_itemsize)
    # Enough for double-buffered in+out plus headroom; never above 48 MiB (v7x-safe).
    vmem_limit = int(min(48 * _MIB, max(32 * _MIB, 3 * tile_bytes)))

    return pl.pallas_call(
        _normalize_kernel,
        out_shape=jax.ShapeDtypeStruct((R, L), out_dtype),
        grid=grid,
        in_specs=[
            pl.BlockSpec(p_block, p_map),                           # scale
            pl.BlockSpec(p_block, p_map),                           # bias
            pl.BlockSpec((block_r, block_l), lambda i, j: (i, j)),  # image slab
        ],
        out_specs=pl.BlockSpec((block_r, block_l), lambda i, j: (i, j)),
        compiler_params=pltpu.CompilerParams(
            dimension_semantics=("parallel", "parallel"),
            vmem_limit_bytes=vmem_limit,
        ),
    )(scale2d, bias2d, img2d)


@jax.jit
def normalization(img, mean, std):
    """(img - mean[:,None,None]) / std[:,None,None] for an NCHW image."""
    N, C, H, W = img.shape

    # Integer images would otherwise be truncated back to ints by the final cast.
    if not jnp.issubdtype(img.dtype, jnp.floating):
        img = img.astype(jnp.float32)
    out_dtype = img.dtype

    mean_f32 = mean.astype(jnp.float32).reshape(C)
    std_f32 = std.astype(jnp.float32).reshape(C)
    scale = 1.0 / std_f32                # (C,)
    bias = -mean_f32 * scale             # (C,)

    L = H * W
    R = N * C
    if L >= 128:
        # Lane-dense primary layout: rows = (n, c) planes.
        img2d = img.reshape(R, L)
        scale2d = jnp.tile(scale, N).reshape(R, 1)
        bias2d = jnp.tile(bias, N).reshape(R, 1)
    else:
        # Small-spatial fallback: keep lanes wide via (N, C*H*W); params per lane.
        L2 = C * H * W
        img2d = img.reshape(N, L2)
        scale2d = jnp.repeat(scale, L).reshape(1, L2)
        bias2d = jnp.repeat(bias, L).reshape(1, L2)

    out2d = _normalize_2d(img2d, scale2d, bias2d, out_dtype)
    return out2d.reshape(N, C, H, W)


if __name__ == "__main__":
    key = jax.random.PRNGKey(0)

    N, C, H, W = 2, 4, 16, 16
    img = jax.random.uniform(key, (N, C, H, W), dtype=jnp.float32)

    # Deterministic "parameters" (mimics torch.tensor(mean)/torch.tensor(std)
    # passed to __init__); synthetic values, not a checkpoint load.
    mean = jnp.array([0.485, 0.456, 0.406, 0.5], dtype=jnp.float32)
    std = jnp.array([0.229, 0.224, 0.225, 0.25], dtype=jnp.float32)

    out = normalization(img, mean, std)
    out = jax.block_until_ready(out)

    # Reference check (pure JAX, same semantics as the PyTorch forward).
    # Tolerance loosened slightly: kernel uses x*(1/std) + (-mean/std).
    ref = (img - mean[None, :, None, None]) / std[None, :, None, None]
    assert out.shape == (N, C, H, W)
    assert out.dtype == img.dtype
    assert jnp.allclose(out, ref, atol=1e-5, rtol=1e-5)

    print("KERNEL_OK")
</pallas_src>

<mosaic_0001>
module attributes {stable_mosaic.version = 11 : i64} {
  func.func @_normalize_kernel(%arg0: i32, %arg1: i32, %arg2: memref<8x1xf32, #tpu.memory_space<vmem>>, %arg3: memref<8x1xf32, #tpu.memory_space<vmem>>, %arg4: memref<8x128xf32, #tpu.memory_space<vmem>>, %arg5: memref<8x128xf32, #tpu.memory_space<vmem>>) attributes {dimension_semantics = [#tpu.dimension_semantics<parallel>, #tpu.dimension_semantics<parallel>], iteration_bounds = array<i64: 1, 2>, scalar_prefetch = 0 : i64, scratch_operands = 0 : i64, tpu.core_type = #tpu.core_type<tc>, window_params = [{transform_indices = @transform_0, window_bounds = array<i64: 8, 1>}, {transform_indices = @transform_1, window_bounds = array<i64: 8, 1>}, {transform_indices = @transform_2, window_bounds = array<i64: 8, 128>}, {transform_indices = @transform_3, window_bounds = array<i64: 8, 128>}]} {
    %c0 = arith.constant 0 : index
    %c0_0 = arith.constant 0 : index
    %0 = vector.load %arg4[%c0, %c0_0] : memref<8x128xf32, #tpu.memory_space<vmem>>, vector<8x128xf32>
    %c0_1 = arith.constant 0 : index
    %c0_2 = arith.constant 0 : index
    %1 = vector.load %arg2[%c0_1, %c0_2] : memref<8x1xf32, #tpu.memory_space<vmem>>, vector<8x1xf32>
    %c0_3 = arith.constant 0 : index
    %c0_4 = arith.constant 0 : index
    %2 = vector.load %arg3[%c0_3, %c0_4] : memref<8x1xf32, #tpu.memory_space<vmem>>, vector<8x1xf32>
    %3 = vector.broadcast %1 : vector<8x1xf32> to vector<8x128xf32>
    %4 = arith.mulf %0, %3 : vector<8x128xf32>
    %5 = vector.broadcast %2 : vector<8x1xf32> to vector<8x128xf32>
    %6 = arith.addf %4, %5 : vector<8x128xf32>
    %c0_5 = arith.constant 0 : index
    %c0_6 = arith.constant 0 : index
    %7 = vector.load %arg5[%c0_5, %c0_6] : memref<8x128xf32, #tpu.memory_space<vmem>>, vector<8x128xf32>
    tpu.vector_store %arg5[%c0_5, %c0_6], %6 {strides = array<i32>} : memref<8x128xf32, #tpu.memory_space<vmem>>, vector<8x128xf32>,
    return
  }
  func.func @transform_0(%arg0: i32, %arg1: i32) -> (i32, i32) {
    %c0_i32 = arith.constant 0 : i32
    %c0_i32_0 = arith.constant 0 : i32
    return %arg0, %c0_i32 : i32, i32
  }
  func.func @transform_1(%arg0: i32, %arg1: i32) -> (i32, i32) {
    %c0_i32 = arith.constant 0 : i32
    %c0_i32_0 = arith.constant 0 : i32
    return %arg0, %c0_i32 : i32, i32
  }
  func.func @transform_2(%arg0: i32, %arg1: i32) -> (i32, i32) {
    %c0_i32 = arith.constant 0 : i32
    return %arg0, %arg1 : i32, i32
  }
  func.func @transform_3(%arg0: i32, %arg1: i32) -> (i32, i32) {
    %c0_i32 = arith.constant 0 : i32
    return %arg0, %arg1 : i32, i32
  }
}

</mosaic_0001>

<bundles_post_ra>
// kernel: tile.18
= control target key start
LH: loop header
LB: loop body
LE: loop exit
PB: predicated region body
PF: predicated region fallthrough
CT: control target
= control target key end

     0   :  { %s22_s0 = inlined_call_operand.vmem [shape: f32[4], index: 0, kind: input, shape index: {}]   ;;  %s23_s1 = inlined_call_operand.vmem [shape: f32[2,4], index: 1, kind: output, shape index: {}]  }
   0x1   :  { %v4_v0 = vld [vmem:[%s22_s0] ss:$0 sm:$0xff] }
   0x2   :  { %5 = vst [vmem:[%s23_s1] sm:$0x3] %v4_v0 }

// kernel: tile.0
= control target key start
LH: loop header
LB: loop body
LE: loop exit
PB: predicated region body
PF: predicated region fallthrough
CT: control target
= control target key end

     0   :  { %s34_s8 = smov 125   ;;  %vm7_vm0 = vcmask 7168   ;;  %s35_s11 = smov 126   ;;  %s61_s0 = inlined_call_operand.vmem [shape: f32[2,4], index: 0, kind: input, shape index: {}]   ;;  %s62_s1 = inlined_call_operand.vmem [shape: f32[8,1], index: 1, kind: output, shape index: {}]  }
   0x1   :  { %v4_v0 = vld [vmem:[%s61_s0] sm:$0x3]  ;;  %s33_s0 = smov 127  }
   0x2   :  { %5 = vst [vmem:[#allocation0] sm:$0x3] %v4_v0 }
   0x9   :  { %v9_v1 = vld [vmem:[#allocation0] sm:$0x3]  }
   0xa   :  { %v21_v2 = vld [vmem:[#allocation0] sm:$0x3]   ;;  %10 = vrot.lane.b32.xlu0 %v9_v1, %s33_s0 }
   0xb   :  { %22 = vrot.lane.b32.xlu1 %v21_v2, %s34_s8  ;;  %v6_v3 = vld [vmem:[#allocation0] sm:$0x3]  }
   0xc   :  { %v15_v4 = vld [vmem:[#allocation0] sm:$0x3]   ;;  %8 = vst.msk [vmem:[%s62_s1] ss:$4 sm:$0x3] %vm7_vm0, %v6_v3  }
   0xe   :  { %16 = vrot.lane.b32.xlu0 %v15_v4, %s35_s11 }
  0x7c   :  { %v11_v5 = vpop.permute.xlu0 %10  }
  0x7d   :  { %v23_v6 = vpop.permute.xlu1 %22   ;;  %27 = vst.msk [vmem:[%s62_s1 + $0x1] ss:$4 sm:$0x3] %vm7_vm0, %v11_v5  }
  0x7e   :  { %29 = vst.msk [vmem:[%s62_s1 + $0x3] ss:$4 sm:$0x3] %vm7_vm0, %v23_v6  }
  0x80   :  { %v17_v7 = vpop.permute.xlu0 %16  }
  0x81   :  { %28 = vst.msk [vmem:[%s62_s1 + $0x2] ss:$4 sm:$0x3] %vm7_vm0, %v17_v7  }

// kernel: normalization.1
= control target key start
LH: loop header
LB: loop body
LE: loop exit
PB: predicated region body
PF: predicated region fallthrough
CT: control target
= control target key end

     0   :  { %s448_s12 = smov 0   ;;  %s450_s13 = smov 0   ;;  %s480_s0 = inlined_call_operand.vmem [shape: f32[8,1], index: 0, kind: input, shape index: {}]   ;;  %s481_s1 = inlined_call_operand.vmem [shape: f32[8,1], index: 1, kind: input, shape index: {}]   ;;  %s482_s2 = inlined_call_operand.vmem [shape: f32[8,256], index: 2, kind: input, shape index: {}]   ;;  %s483_s3 = inlined_call_operand.vmem [shape: f32[8,256], index: 3, kind: output, shape index: {}]  }
   0x1   :  { %s452_s14 = smov 0  }
   0x2 LB: > { %s22_s15 = sadd.s32 1, %s421_s13  ;;  %p372_p0 = scmp.ge.s32.totalorder %s425_s14, 1  ;;  %s425_s14 = sphi %s452_s14, %s13_s14   ;;  %s421_s13 = sphi %s450_s13, %s485_s13   ;;  %s417_s12 = sphi %s448_s12, %s484_s12  }
   0x3   : > { %p23_p1 = scmp.ge.s32.totalorder %s22_s15, 2  ;;  %p174_p2 = scmp.lt.s32.totalorder %s425_s14, 3 }
   0x5   : > { %s487_s15 = smov (%p23_p1, %s22_s15), 0  ;;  %p175_p3 = pnand %p372_p0, %p174_p2 }
   0x6   : > { %v237_v0 = vld [vmem:[%s480_s0] sm:$0xff] (!%p175_p3)  ;;  %v427_v1 = vmov (!%p175_p3), 0   ;;  %p222_p4 = scmp.lt.s32.totalorder (!%p175_p3), %s417_s12, 1 }
   0x7   : > { %178 = sbr.rel (%p175_p3) target bundleno = 143 (0x8f), region = 32  ;;  %402 = vset.pattern.permute.xlu0 (!%p175_p3), %v427_v1  ;;  %v238_v2 = vld [vmem:[%s481_s1] sm:$0xff] (!%p175_p3) }
   0x8   : > { %241 = vperm.xlu0 (!%p175_p3), %402, %v237_v0  }
   0xc   : > { %247 = vperm.xlu0 (!%p175_p3), %402, %v238_v2  }
   0xe   : > { %s489_s12 = smov (!%p222_p4, %s417_s12), 1 }
   0xf   : > { %s373_s20 = sshll.u32 %s489_s12, 3 }
  0x10   : > { %s227_s23 = scalar_lea.vmem %s482_s2, %s373_s20  ;;  %s235_s26 = scalar_lea.vmem %s483_s3, %s373_s20 }
  0x11   : > { %v236_v4 = vld [vmem:[%s227_s23] sm:$0xff] }
  0x87   : > { %v242_v3 = vpop.permute.xlu0 %241 }
  0x88   : > { %v244_v5 = vmul.f32 %v242_v3, %v236_v4 }
  0x8b   : > { %v248_v6 = vpop.permute.xlu0 %247 }
  0x8c   : > { %v250_v7 = vadd.f32 %v248_v6, %v244_v5 }
  0x8e   : > { %251 = vst [vmem:[%s235_s26] sm:$0xff] %v250_v7 }
  0x8f PF: > { %s13_s14 = sadd.s32 1, %s425_s14   ;;  %s484_s12 = smov %s421_s13 }
  0x90   : > { %p10_p5 = scmp.ge.s32.totalorder %s13_s14, 4   ;;  %s485_s13 = smov %s487_s15 }
  0x92   :  { %12 = sbr.rel (!%p10_p5) target bundleno = 2 (0x2), region = 68 }

</bundles_post_ra>
